<compile_context>
chip_gen: v7x
topology: tpu7x:2x2x1
jax: 0.10.0
libtpu: 0.0.40
codegen_flags: <defaults>
</compile_context>

<pallas_src>
import jax
import jax.numpy as jnp
from jax.experimental import pallas as pl
from jax.experimental.pallas import tpu as pltpu

_BN_EPS = 1e-5
_LANE = 128                      # Cout tile (lane width)
_TM = 256                        # M (pixel-row) tile
_VMEM_LIMIT = 32 * 1024 * 1024   # explicit scoped-VMEM budget (plenty of headroom)


def _round_up(x, m):
    return (x + m - 1) // m * m


# ----------------------------------------------------------------------------
# Pallas kernels
# ----------------------------------------------------------------------------
def _matmul_stats_kernel(p_ref, w_ref, y_ref, st_ref):
    """Pass A: y = p @ w (bf16 in, f32 acc) + per-tile per-channel sum/sumsq."""
    y = jnp.dot(p_ref[...], w_ref[...], preferred_element_type=jnp.float32)
    y_ref[...] = y
    s = jnp.sum(y, axis=0, keepdims=True)          # (1, tn) per-channel sum
    q = jnp.sum(y * y, axis=0, keepdims=True)      # (1, tn) per-channel sumsq
    row = jax.lax.broadcasted_iota(jnp.int32, st_ref.shape[1:], 0)   # (8, tn)
    st_ref[0] = jnp.where(row == 0, s, 0.0) + jnp.where(row == 1, q, 0.0)


def _bn_relu_kernel(y_ref, scale_ref, shift_ref, o_ref):
    """Pass B: o = relu(y * scale + shift)."""
    o_ref[...] = jnp.maximum(y_ref[...] * scale_ref[...] + shift_ref[...], 0.0)


def _bn_relu_add_kernel(y_ref, scale_ref, shift_ref, r_ref, o_ref):
    """Pass B with fused residual: o = relu(y * scale + shift) + r."""
    o_ref[...] = (jnp.maximum(y_ref[...] * scale_ref[...] + shift_ref[...], 0.0)
                  + r_ref[...])


def _compiler_params():
    return pltpu.CompilerParams(
        dimension_semantics=("parallel", "parallel"),
        vmem_limit_bytes=_VMEM_LIMIT)


# ----------------------------------------------------------------------------
# Fused conv (as im2col matmul) + training-mode BN + ReLU (+ residual)
# ----------------------------------------------------------------------------
def fused_conv_bn_relu(patches, w_mat, gamma, beta, residual=None):
    """relu(batchnorm(patches @ w_mat) * gamma + beta) [+ residual].

    BatchNorm uses batch statistics over the M rows (training mode), computed
    exactly via the two-pass scheme (per-tile partials + tiny finalize).
    """
    M, K = patches.shape
    C = w_mat.shape[1]
    tn = _LANE
    tm = min(_TM, _round_up(M, 8))
    m_pad = _round_up(M, tm)
    c_pad = _round_up(C, tn)
    num_m, num_n = m_pad // tm, c_pad // tn

    # Lane-dense / tile-aligned zero padding. Padded rows of `p` are exactly
    # zero, so they contribute nothing to the BN sums (stats stay exact).
    p = jnp.zeros((m_pad, K), jnp.bfloat16).at[:M, :].set(
        patches.astype(jnp.bfloat16))
    w = jnp.zeros((K, c_pad), jnp.bfloat16).at[:, :C].set(
        w_mat.astype(jnp.bfloat16))

    # ---- pass A: tiled matmul + per-tile partial BN statistics --------------
    # TODO(synk): for very large C_in (K = 9*C_in), add a K reduction grid axis
    # with an f32 VMEM accumulator; for this module K fits easily in VMEM.
    # TODO(synk): the 9x im2col patch stream could be removed entirely by
    # folding the 3x3 taps into the K axis and indexing shifted NHWC windows.
    y, stats = pl.pallas_call(
        _matmul_stats_kernel,
        out_shape=(jax.ShapeDtypeStruct((m_pad, c_pad), jnp.float32),
                   jax.ShapeDtypeStruct((num_m, 8, c_pad), jnp.float32)),
        grid=(num_m, num_n),
        in_specs=[pl.BlockSpec((tm, K), lambda i, j: (i, 0)),
                  pl.BlockSpec((K, tn), lambda i, j: (0, j))],
        out_specs=(pl.BlockSpec((tm, tn), lambda i, j: (i, j)),
                   pl.BlockSpec((1, 8, tn), lambda i, j: (i, 0, j))),
        compiler_params=_compiler_params(),
    )(p, w)

    # ---- finalize BN stats: tiny (C_pad,) vectors, plain JAX ----------------
    sum_c = jnp.sum(stats[:, 0, :], axis=0)
    ssq_c = jnp.sum(stats[:, 1, :], axis=0)
    mean = sum_c / M
    var = jnp.maximum(ssq_c / M - mean * mean, 0.0)     # biased (training BN)
    g = jnp.zeros((c_pad,), jnp.float32).at[:C].set(gamma.astype(jnp.float32))
    b = jnp.zeros((c_pad,), jnp.float32).at[:C].set(beta.astype(jnp.float32))
    scale = g * jax.lax.rsqrt(var + _BN_EPS)            # gamma folded in
    shift = b - mean * scale
    scale = scale.reshape(1, c_pad)
    shift = shift.reshape(1, c_pad)

    # ---- pass B: tiled normalize -> relu (+ fused residual add) -------------
    if residual is None:
        kernel = _bn_relu_kernel
        extra_specs, extra_args = [], []
    else:
        kernel = _bn_relu_add_kernel
        r = jnp.zeros((m_pad, c_pad), jnp.float32).at[:M, :C].set(
            residual.astype(jnp.float32))
        extra_specs = [pl.BlockSpec((tm, tn), lambda i, j: (i, j))]
        extra_args = [r]

    out = pl.pallas_call(
        kernel,
        out_shape=jax.ShapeDtypeStruct((m_pad, c_pad), jnp.float32),
        grid=(num_m, num_n),
        in_specs=[pl.BlockSpec((tm, tn), lambda i, j: (i, j)),
                  pl.BlockSpec((1, tn), lambda i, j: (0, j)),
                  pl.BlockSpec((1, tn), lambda i, j: (0, j))] + extra_specs,
        out_specs=pl.BlockSpec((tm, tn), lambda i, j: (i, j)),
        compiler_params=_compiler_params(),
    )(y, scale, shift, *extra_args)

    return out[:M, :C]


# ----------------------------------------------------------------------------
# Glue: im2col + weight reshaping (pure data movement, plain JAX)
# ----------------------------------------------------------------------------
def im2col(x_nhwc, kh, kw, stride, pad):
    n, h, w, c = x_nhwc.shape
    xp = (jnp.pad(x_nhwc, ((0, 0), (pad, pad), (pad, pad), (0, 0)))
          if pad else x_nhwc)
    oh = (h + 2 * pad - kh) // stride + 1
    ow = (w + 2 * pad - kw) // stride + 1
    cols = []
    for i in range(kh):
        for j in range(kw):
            cols.append(xp[:, i:i + stride * (oh - 1) + 1:stride,
                           j:j + stride * (ow - 1) + 1:stride, :])
    patches = jnp.concatenate(cols, axis=-1)             # (n, oh, ow, kh*kw*c)
    return patches.reshape(n * oh * ow, kh * kw * c), (n, oh, ow)


def weight_to_matrix(w_oihw):
    # PyTorch (Cout, Cin, KH, KW) -> (KH*KW*Cin, Cout), matching im2col order.
    co, ci, kh, kw = w_oihw.shape
    return jnp.transpose(w_oihw, (2, 3, 1, 0)).reshape(kh * kw * ci, co)


# ----------------------------------------------------------------------------
# Identity_Block module
# ----------------------------------------------------------------------------
class IdentityBlock:
    """JAX/Pallas port of the PyTorch `Identity_Block` (training-mode BN)."""

    def __init__(self, channel_size, stride_size, key):
        self.stride = stride_size
        c = channel_size
        k1, k2 = jax.random.split(key)
        # Conv weights (no bias, like the PyTorch module); BN affine params at
        # PyTorch defaults (gamma=1, beta=0).
        self.w1 = 0.1 * jax.random.normal(k1, (c, c, 3, 3), jnp.float32)
        self.g1 = jnp.ones((c,), jnp.float32)
        self.b1 = jnp.zeros((c,), jnp.float32)
        self.w2 = 0.1 * jax.random.normal(k2, (c, c, 3, 3), jnp.float32)
        self.g2 = jnp.ones((c,), jnp.float32)
        self.b2 = jnp.zeros((c,), jnp.float32)

    def __call__(self, x_nchw):
        # NOTE: like the PyTorch module, the identity shortcut only matches
        # shapes when stride_size == 1.
        x = jnp.transpose(x_nchw, (0, 2, 3, 1))          # NCHW -> NHWC (f32)
        c = self.w1.shape[0]

        # conv1 (3x3, stride) + BN + ReLU
        p1, (n, oh, ow) = im2col(x.astype(jnp.bfloat16), 3, 3, self.stride, 1)
        y1 = fused_conv_bn_relu(p1, weight_to_matrix(self.w1), self.g1, self.b1)
        y1_img = y1.reshape(n, oh, ow, c)

        # conv2 (3x3, stride 1) + BN + ReLU, residual add fused into pass B
        p2, _ = im2col(y1_img.astype(jnp.bfloat16), 3, 3, 1, 1)
        shortcut = x.reshape(-1, c)                      # identity shortcut (f32)
        out = fused_conv_bn_relu(p2, weight_to_matrix(self.w2), self.g2,
                                 self.b2, residual=shortcut)
        out_img = out.reshape(n, oh, ow, c)
        return jnp.transpose(out_img, (0, 3, 1, 2))      # NHWC -> NCHW


# ----------------------------------------------------------------------------
# Pure-JAX reference (mirrors the PyTorch forward, training-mode BN)
# ----------------------------------------------------------------------------
def _ref_conv(x, w, stride, pad):
    return jax.lax.conv_general_dilated(
        x, w, (stride, stride), [(pad, pad), (pad, pad)],
        dimension_numbers=("NCHW", "OIHW", "NCHW"))


def _ref_bn_relu(y, gamma, beta):
    mean = y.mean(axis=(0, 2, 3), keepdims=True)
    var = jnp.square(y - mean).mean(axis=(0, 2, 3), keepdims=True)
    y_hat = (y - mean) * jax.lax.rsqrt(var + _BN_EPS)
    return jnp.maximum(y_hat * gamma.reshape(1, -1, 1, 1)
                       + beta.reshape(1, -1, 1, 1), 0.0)


def reference_forward(block, x):
    y = _ref_bn_relu(_ref_conv(x, block.w1, block.stride, 1), block.g1, block.b1)
    y = _ref_bn_relu(_ref_conv(y, block.w2, 1, 1), block.g2, block.b2)
    return y + x


# ----------------------------------------------------------------------------
if __name__ == "__main__":
    key = jax.random.PRNGKey(0)
    kx, kp = jax.random.split(key)
    x = jax.random.normal(kx, (2, 4, 16, 16), jnp.float32)   # NCHW

    block = IdentityBlock(channel_size=4, stride_size=1, key=kp)

    out = jax.block_until_ready(block(x))
    ref = reference_forward(block, x)

    assert out.shape == x.shape, out.shape
    assert bool(jnp.all(jnp.isfinite(out)))
    max_err = float(jnp.max(jnp.abs(out - ref)))
    assert bool(jnp.allclose(out, ref, rtol=5e-2, atol=5e-2)), max_err

    print("KERNEL_OK")
</pallas_src>

<mosaic_0001>
module attributes {stable_mosaic.version = 11 : i64} {
  func.func @_matmul_stats_kernel(%arg0: i32, %arg1: i32, %arg2: memref<256x36xbf16, #tpu.memory_space<vmem>>, %arg3: memref<36x128xbf16, #tpu.memory_space<vmem>>, %arg4: memref<256x128xf32, #tpu.memory_space<vmem>>, %arg5: memref<1x8x128xf32, #tpu.memory_space<vmem>>) attributes {dimension_semantics = [#tpu.dimension_semantics<parallel>, #tpu.dimension_semantics<parallel>], iteration_bounds = array<i64: 2, 1>, scalar_prefetch = 0 : i64, scratch_operands = 0 : i64, tpu.core_type = #tpu.core_type<tc>, window_params = [{transform_indices = @transform_0, window_bounds = array<i64: 256, 36>}, {transform_indices = @transform_1, window_bounds = array<i64: 36, 128>}, {transform_indices = @transform_2, window_bounds = array<i64: 256, 128>}, {transform_indices = @transform_3, window_bounds = array<i64: 1, 8, 128>}]} {
    %c0 = arith.constant 0 : index
    %c0_0 = arith.constant 0 : index
    %0 = vector.load %arg2[%c0, %c0_0] : memref<256x36xbf16, #tpu.memory_space<vmem>>, vector<256x36xbf16>
    %c0_1 = arith.constant 0 : index
    %c0_2 = arith.constant 0 : index
    %1 = vector.load %arg3[%c0_1, %c0_2] : memref<36x128xbf16, #tpu.memory_space<vmem>>, vector<36x128xbf16>
    %cst = arith.constant dense<0.000000e+00> : vector<256x128xf32>
    %2 = tpu.matmul %0, %1, %cst {dimension_numbers = #tpu.dot_dimension_numbers<[1], [0], [0], [1], [0, 0, 1, 1], [], []>} : vector<256x36xbf16>, vector<36x128xbf16>, vector<256x128xf32> -> vector<256x128xf32>
    %c0_3 = arith.constant 0 : index
    %c0_4 = arith.constant 0 : index
    %3 = vector.load %arg4[%c0_3, %c0_4] : memref<256x128xf32, #tpu.memory_space<vmem>>, vector<256x128xf32>
    tpu.vector_store %arg4[%c0_3, %c0_4], %2 {strides = array<i32>} : memref<256x128xf32, #tpu.memory_space<vmem>>, vector<256x128xf32>,
    %cst_5 = arith.constant dense<0.000000e+00> : vector<128xf32>
    %4 = vector.multi_reduction <add>, %2, %cst_5 [0] : vector<256x128xf32> to vector<128xf32>
    %5 = vector.shape_cast %4 : vector<128xf32> to vector<1x128xf32>
    %6 = arith.mulf %2, %2 : vector<256x128xf32>
    %cst_6 = arith.constant dense<0.000000e+00> : vector<128xf32>
    %7 = vector.multi_reduction <add>, %6, %cst_6 [0] : vector<256x128xf32> to vector<128xf32>
    %8 = vector.shape_cast %7 : vector<128xf32> to vector<1x128xf32>
    %9 = tpu.iota {dimensions = array<i32: 0>} : vector<8x128xi32>
    %c0_i32 = arith.constant 0 : i32
    %10 = vector.broadcast %c0_i32 : i32 to vector<8x128xi32>
    %11 = arith.cmpi eq, %9, %10 : vector<8x128xi32>
    %cst_7 = arith.constant 0.000000e+00 : f32
    %12 = vector.shape_cast %5 : vector<1x128xf32> to vector<1x128xf32>
    %13 = vector.broadcast %12 : vector<1x128xf32> to vector<8x128xf32>
    %14 = vector.broadcast %cst_7 : f32 to vector<8x128xf32>
    %15 = arith.select %11, %13, %14 : vector<8x128xi1>, vector<8x128xf32>
    %c1_i32 = arith.constant 1 : i32
    %16 = vector.broadcast %c1_i32 : i32 to vector<8x128xi32>
    %17 = arith.cmpi eq, %9, %16 : vector<8x128xi32>
    %cst_8 = arith.constant 0.000000e+00 : f32
    %18 = vector.shape_cast %8 : vector<1x128xf32> to vector<1x128xf32>
    %19 = vector.broadcast %18 : vector<1x128xf32> to vector<8x128xf32>
    %20 = vector.broadcast %cst_8 : f32 to vector<8x128xf32>
    %21 = arith.select %17, %19, %20 : vector<8x128xi1>, vector<8x128xf32>
    %22 = arith.addf %15, %21 : vector<8x128xf32>
    %c0_9 = arith.constant 0 : index
    %c0_10 = arith.constant 0 : index
    %c0_11 = arith.constant 0 : index
    %23 = vector.load %arg5[%c0_9, %c0_10, %c0_11] : memref<1x8x128xf32, #tpu.memory_space<vmem>>, vector<1x8x128xf32>
    %24 = vector.shape_cast %23 : vector<1x8x128xf32> to vector<8x128xf32>
    %25 = vector.shape_cast %22 : vector<8x128xf32> to vector<1x8x128xf32>
    tpu.vector_store %arg5[%c0_9, %c0_10, %c0_11], %25 {strides = array<i32>} : memref<1x8x128xf32, #tpu.memory_space<vmem>>, vector<1x8x128xf32>,
    return
  }
  func.func @transform_0(%arg0: i32, %arg1: i32) -> (i32, i32) {
    %c0_i32 = arith.constant 0 : i32
    %c0_i32_0 = arith.constant 0 : i32
    return %arg0, %c0_i32 : i32, i32
  }
  func.func @transform_1(%arg0: i32, %arg1: i32) -> (i32, i32) {
    %c0_i32 = arith.constant 0 : i32
    %c0_i32_0 = arith.constant 0 : i32
    return %c0_i32, %arg1 : i32, i32
  }
  func.func @transform_2(%arg0: i32, %arg1: i32) -> (i32, i32) {
    %c0_i32 = arith.constant 0 : i32
    return %arg0, %arg1 : i32, i32
  }
  func.func @transform_3(%arg0: i32, %arg1: i32) -> (i32, i32, i32) {
    %c0_i32 = arith.constant 0 : i32
    %c0_i32_0 = arith.constant 0 : i32
    return %arg0, %c0_i32, %arg1 : i32, i32, i32
  }
}

</mosaic_0001>

<bundles_post_ra>
// kernel: tpu_custom_call.1
= control target key start
LH: loop header
LB: loop body
LE: loop exit
PB: predicated region body
PF: predicated region fallthrough
CT: control target
= control target key end

     0   :  { %9 = vsyncpa [#allocation3], 0  ;;  %s1520_s0 = inlined_call_operand.vmem [shape: bf16[512,36], index: 0, kind: input, shape index: {}]   ;;  %s1521_s1 = inlined_call_operand.vmem [shape: bf16[36,128], index: 1, kind: input, shape index: {}]   ;;  %s1522_s2 = inlined_call_operand.hbm [shape: f32[512,128], index: 2, kind: output, shape index: {0}]   ;;  %s1523_s3 = inlined_call_operand.hbm [shape: f32[2,8,128], index: 3, kind: output, shape index: {1}]  }
   0x1   :  { %11 = vsyncpa [#allocation3 + $0x1], 0 }
   0x2   :  { %12 = vsyncpa [#allocation5], 0 }
   0x3   :  { %14 = vsyncpa [#allocation5 + $0x1], 0  ;;  %s1198_s12 = smov 0   ;;  %s1200_s13 = smov 0  }
   0x4   :  { %s1202_s14 = smov 0   ;;  %s1204_s15 = smov 0  }
   0x5   :  { %s1206_s16 = smov 0   ;;  %s1208_s17 = smov 0  }
   0x6 LB: > { %s863_s18 = sadd.s32 4294967295, %s1172_s17   ;;  %s864_s19 = sadd.s32 4294967294, %s1172_s17   ;;  %s1172_s17 = sphi %s1208_s17, %s20_s17   ;;  %s1168_s16 = sphi %s1206_s16, %s1530_s16   ;;  %s1164_s15 = sphi %s1204_s15, %s1529_s15   ;;  %s1160_s14 = sphi %s1202_s14, %s1528_s14   ;;  %s1156_s13 = sphi %s1200_s13, %s1527_s13   ;;  %s1152_s12 = sphi %s1198_s12, %s1526_s12  }
   0x7   : > { %s32_s20 = sadd.s32 1, %s1168_s16  ;;  %s93_s21 = sadd.s32 1, %s1160_s14 }
   0x8   : > { %p34_p0 = scmp.ge.s32.totalorder %s32_s20, 2  ;;  %p103_p1 = scmp.ne.s32.totalorder %s1160_s14, %s1156_s13 }
   0x9   : > { %p104_p2 = scmp.eq.s32.totalorder %s863_s18, 1  ;;  %p109_p3 = scmp.ne.s32.totalorder %s1156_s13, %s1152_s12 }
   0xa   : > { %s1532_s20 = smov (%p34_p0, %s32_s20), 0  ;;  %p110_p5 = scmp.eq.s32.totalorder %s864_s19, 1 }
   0xb   : > { %p1238_p4 = por %p104_p2, %p103_p1  ;;  %s88_s23 = ssub.s32 %s1168_s16, %s1532_s20 }
   0xc   : > { %p868_p6 = scmp.ge.s32.totalorder %s1172_s17, 1  ;;  %p91_p7 = scmp.eq.s32.totalorder %s88_s23, 0 }
   0xd   : > { %p1245_p8 = por %p110_p5, %p109_p3  ;;  %p172_p9 = scmp.lt.s32.totalorder %s1172_s17, 3 }
   0xe   : > { %s1251_s25 = scalar_select %p91_p7, %s1160_s14, %s93_s21  }
   0xf   : > { %p173_p10 = pnand %p868_p6, %p172_p9 }
  0x10   : > { %v1043_v0 = vld [vmem:[%s1521_s1] sm:$0xff] (!%p173_p10)   ;;  %v1044_v1 = vld [vmem:[%s1521_s1 + $0x8] sm:$0xff] (!%p173_p10)   ;;  %s871_s30 = sshll.u32 (!%p173_p10), %s1164_s15, 5  ;;  %v1045_v2 = vld [vmem:[%s1521_s1 + $0x10] ss:$0 sps:$4 sm:$0x33] (!%p173_p10)  }
  0x11   : > { %176 = sbr.rel (%p173_p10) target bundleno = 348 (0x15c), region = 28  ;;  %935 = vmatprep.subr.bf16.mxu0 (!%p173_p10), %v1043_v0  ;;  %p206_p11 = scmp.lt.s32.totalorder (!%p173_p10), %s871_s30, 63  ;;  %973 = vmatprep.subr.bf16.mxu1 (!%p173_p10), %v1043_v0  ;;  %vm398_vm0 = vcmask (!%p173_p10), 1041408   ;;  %vm349_vm1 = vcmask (!%p173_p10), 293888  }
  0x12   : > { %936 = vmatpush3.bf16.msra.mxu0 (!%p173_p10), %v1043_v0  ;;  %976 = vmatpush3.bf16.msra.mxu1 (!%p173_p10), %v1043_v0  ;;  %v400_v3 = vsel (!%p173_p10), %vm398_vm0, %v1045_v2, 0  ;;  %s1301_s10 = sand.u32 (!%p173_p10), 1, %s1156_s13   ;;  %s915_s19 = sshll.u32 (!%p173_p10), %s1164_s15, 12 }
  0x13   : > { %937 = vmatprep.subr.bf16.mxu0 (!%p173_p10), %v1044_v1  ;;  %974 = vmatprep.subr.bf16.mxu1 (!%p173_p10), %v1044_v1  ;;  %s869_s11 = sshll.u32 (!%p173_p10), %s1301_s10, 8  ;;  %s1381_s27 = scalar_lea.hbm (!%p173_p10), %s1522_s2, %s915_s19 }
  0x14   : > { %s1304_s18 = scalar_lea.vmem (!%p173_p10), [#allocation2], %s869_s11  ;;  %s710_s28 = scalar_lea.sflag (!%p173_p10), [#allocation3], %s1301_s10 }
  0x15   : > { %s729_s21 = sshll.u32 (!%p173_p10), %s1304_s18, 4  ;;  %s1383_s21 = int_to_ptr.vmem [resolvable:$true] %s729_s21 }
  0x16   : > { %938 = vmatpush3.bf16.msra.mxu0 (!%p173_p10), %v1044_v1  ;;  %977 = vmatpush3.bf16.msra.mxu1 (!%p173_p10), %v1044_v1  ;;  %s1062_s29 = scalar_lea.vmem (!%p173_p10), %s1383_s21, 4096 }
  0x17   : > { %979 = vmatprep.subr.msk.bf16.mxu0 (!%p173_p10), %vm398_vm0, %v1045_v2  ;;  %980 = vmatprep.subr.msk.bf16.mxu1 (!%p173_p10), %vm398_vm0, %v1045_v2  ;;  %p1063_p12 = scmp.ne.s32.totalorder (!%p173_p10), %s1383_s21, %s1062_s29 }
  0x18   : > { %s1534_s30 = smov (!%p206_p11, %s871_s30), 63 }
  0x19   : > { %s872_s6 = sshll.u32 %s1534_s30, 2  ;;  %p1064_p13 = pnand %p1063_p12, %p1238_p4 }
  0x1a   : > { %s1266_s9 = scalar_lea.vmem %s1520_s0, %s872_s6  ;;  %940 = vmatpush3.bf16.msra.mxu0 %v400_v3  ;;  %978 = vmatpush3.bf16.msra.mxu1 %v400_v3  ;;  %s1174_s30 = smov [#allocation2]  }
  0x1b   : > { %v1046_v4 = vld [vmem:[%s1266_s9] sm:$0xff]   ;;  %v1047_v5 = vld [vmem:[%s1266_s9 + $0x8] sm:$0xff]   ;;  %v1048_v6 = vld [vmem:[%s1266_s9 + $0x10] sm:$0xff]   ;;  %p1065_p0 = pneg %p1064_p13  ;;  %s1066_s4 = sshll.u32 %s1174_s30, 4  ;;  %s1067_s4 = int_to_ptr.vmem [resolvable:$false] %s1066_s4 }
  0x1c   : > { %941 = vmatprep.mubr.msk.bf16.mxu0 %vm349_vm1, %v1046_v4  ;;  %v1049_v7 = vld [vmem:[%s1266_s9 + $0x18] sm:$0xff]   ;;  %v1054_v8 = vld [vmem:[%s1266_s9 + $0x40] sm:$0xff]   ;;  %v1055_v9 = vld [vmem:[%s1266_s9 + $0x48] sm:$0xff]   ;;  %s1068_s5 = scalar_lea.vmem %s1067_s4, 8192  ;;  %p1069_p1 = scmp.lt.s32.totalorder %s1383_s21, %s1067_s4 }
  0x1d   : > { %942 = vmatmul.mubr.msk.bf16.vlgmr.msra.gmra.mrb[0].mxu0 %vm349_vm1, %v1047_v5  ;;  %957 = vmatprep.mubr.msk.bf16.mxu1 %vm349_vm1, %v1054_v8  ;;  %v1056_v10 = vld [vmem:[%s1266_s9 + $0x50] sm:$0xff]   ;;  %v1050_v11 = vld [vmem:[%s1266_s9 + $0x20] sm:$0xff]   ;;  %v1057_v12 = vld [vmem:[%s1266_s9 + $0x58] sm:$0xff]   ;;  %p1070_p2 = scmp.lt.s32.totalorder %s1068_s5, %s1062_s29 }
  0x1e   : > { %945 = vmatprep.mubr.msk.bf16.mxu0 %vm349_vm1, %v1048_v6  ;;  %958 = vmatmul.mubr.msk.bf16.vlgmr.msra.gmra.mrb[0].mxu1 %vm349_vm1, %v1055_v9  ;;  %v1058_v13 = vld [vmem:[%s1266_s9 + $0x60] sm:$0xff]   ;;  %v1051_v14 = vld [vmem:[%s1266_s9 + $0x28] sm:$0xff]   ;;  %v1052_v15 = vld [vmem:[%s1266_s9 + $0x30] sm:$0xff]  }
  0x1f   : > { %961 = vmatprep.mubr.msk.bf16.mxu1 %vm349_vm1, %v1056_v10  ;;  %v1059_v16 = vld [vmem:[%s1266_s9 + $0x68] sm:$0xff]   ;;  %v1060_v17 = vld [vmem:[%s1266_s9 + $0x70] sm:$0xff]   ;;  %v1053_v18 = vld [vmem:[%s1266_s9 + $0x38] sm:$0xff]   ;;  %p1071_p3 = por %p1070_p2, %p1069_p1 }
  0x20   : > { %v1061_v19 = vld [vmem:[%s1266_s9 + $0x78] sm:$0xff]  }
  0x21   : > { %p1072_p5 = pnand %p1071_p3, %p1065_p0 }
  0x25   : > { %946 = vmatmul.mubr.msk.bf16.gmra.mrb[4].mxu0 %vm349_vm1, %v1049_v7 }
  0x26   : > { %949 = vmatprep.mubr.msk.bf16.mxu0 %vm349_vm1, %v1050_v11  ;;  %962 = vmatmul.mubr.msk.bf16.gmra.mrb[4].mxu1 %vm349_vm1, %v1057_v12 }
  0x27   : > { %965 = vmatprep.mubr.msk.bf16.mxu1 %vm349_vm1, %v1058_v13 }
  0x2d   : > { %950 = vmatmul.mubr.msk.bf16.gmra.mrb[8].mxu0 %vm349_vm1, %v1051_v14 }
  0x2e   : > { %953 = vmatprep.mubr.msk.bf16.mxu0 %vm349_vm1, %v1052_v15  ;;  %966 = vmatmul.mubr.msk.bf16.gmra.mrb[8].mxu1 %vm349_vm1, %v1059_v16 }
  0x2f   : > { %969 = vmatprep.mubr.msk.bf16.mxu1 %vm349_vm1, %v1060_v17 }
  0x35   : > { %954 = vmatmul.mubr.msk.bf16.gmra.mrb[12].mxu0 %vm349_vm1, %v1053_v18 }
  0x36   : > { %970 = vmatmul.mubr.msk.bf16.gmra.mrb[12].mxu1 %vm349_vm1, %v1061_v19 }
  0xf0   : > { %v943_v20 = vpop.f32.mrb[0].mxu0 }
  0xf1   : > { %565 = vst [vmem:[%s1304_s18 + $0x10] sm:$0xff] %v943_v20  ;;  %v436_v21 = vpop.f32.mrb[1].mxu0  ;;  %v1310_v27 = vpop.f32.mrb[0].mxu1  ;;  %v634_v28 = vmul.f32 %v943_v20, %v943_v20 }
  0xf2   : > { %563 = vst [vmem:[%s1304_s18] sm:$0xff] %v436_v21  ;;  %v944_v22 = vpop.f32.mrb[2].mxu0  ;;  %v632_v24 = vmul.f32 %v436_v21, %v436_v21  ;;  %581 = vst [vmem:[%s1304_s18 + $0x90] sm:$0xff] %v1310_v27  ;;  %v1314_v31 = vpop.f32.mrb[1].mxu1 }
  0xf3   : > { %566 = vst [vmem:[%s1304_s18 + $0x18] sm:$0xff] %v944_v22  ;;  %v439_v23 = vpop.f32.mrb[3].mxu0  ;;  %579 = vst [vmem:[%s1304_s18 + $0x80] sm:$0xff] %v1314_v31  ;;  %v1318_v32 = vpop.f32.mrb[2].mxu1  ;;  %v635_v33 = vmul.f32 %v944_v22, %v944_v22 }
  0xf4   : > { %564 = vst [vmem:[%s1304_s18 + $0x8] sm:$0xff] %v439_v23  ;;  %v595_v25 = vadd.f32 %v439_v23, %v436_v21  ;;  %v633_v26 = vmul.f32 %v439_v23, %v439_v23  ;;  %582 = vst [vmem:[%s1304_s18 + $0x98] sm:$0xff] %v1318_v32  ;;  %v1322_v37 = vpop.f32.mrb[3].mxu1 }
  0xf5   : > { %580 = vst [vmem:[%s1304_s18 + $0x88] sm:$0xff] %v1322_v37 }
  0xf6   : > { %v596_v29 = vadd.f32 %v943_v20, %v595_v25  ;;  %v664_v30 = vadd.f32 %v633_v26, %v632_v24 }
  0xf8   : > { %v665_v34 = vadd.f32 %v664_v30, %v634_v28  ;;  %v947_v35 = vpop.f32.mrb[4].mxu0  ;;  %v597_v36 = vadd.f32 %v944_v22, %v596_v29 }
  0xf9   : > { %569 = vst [vmem:[%s1304_s18 + $0x30] sm:$0xff] %v947_v35  ;;  %v452_v38 = vpop.f32.mrb[5].mxu0  ;;  %v1330_v47 = vpop.f32.mrb[4].mxu1  ;;  %v638_v48 = vmul.f32 %v947_v35, %v947_v35 }
  0xfa   : > { %567 = vst [vmem:[%s1304_s18 + $0x20] sm:$0xff] %v452_v38  ;;  %v598_v39 = vadd.f32 %v597_v36, %v452_v38  ;;  %v636_v40 = vmul.f32 %v452_v38, %v452_v38  ;;  %v666_v41 = vadd.f32 %v665_v34, %v635_v33  ;;  %v948_v42 = vpop.f32.mrb[6].mxu0  ;;  %585 = vst [vmem:[%s1304_s18 + $0xb0] sm:$0xff] %v1330_v47  ;;  %v1334_v51 = vpop.f32.mrb[5].mxu1 }
  0xfb   : > { %570 = vst [vmem:[%s1304_s18 + $0x38] sm:$0xff] %v948_v42  ;;  %v455_v43 = vpop.f32.mrb[7].mxu0  ;;  %583 = vst [vmem:[%s1304_s18 + $0xa0] sm:$0xff] %v1334_v51  ;;  %v1338_v52 = vpop.f32.mrb[6].mxu1  ;;  %v639_v53 = vmul.f32 %v948_v42, %v948_v42 }
  0xfc   : > { %v667_v44 = vadd.f32 %v666_v41, %v636_v40  ;;  %568 = vst [vmem:[%s1304_s18 + $0x28] sm:$0xff] %v455_v43  ;;  %v599_v45 = vadd.f32 %v598_v39, %v455_v43  ;;  %v637_v46 = vmul.f32 %v455_v43, %v455_v43  ;;  %586 = vst [vmem:[%s1304_s18 + $0xb8] sm:$0xff] %v1338_v52  ;;  %v1342_v57 = vpop.f32.mrb[7].mxu1 }
  0xfd   : > { %584 = vst [vmem:[%s1304_s18 + $0xa8] sm:$0xff] %v1342_v57 }
  0xfe   : > { %v600_v49 = vadd.f32 %v947_v35, %v599_v45  ;;  %v668_v50 = vadd.f32 %v667_v44, %v637_v46  ;;  %v648_v35 = vmul.f32 %v1314_v31, %v1314_v31 }
 0x100   : > { %v669_v54 = vadd.f32 %v668_v50, %v638_v48  ;;  %v951_v55 = vpop.f32.mrb[8].mxu0  ;;  %v601_v56 = vadd.f32 %v948_v42, %v600_v49 }
 0x101   : > { %573 = vst [vmem:[%s1304_s18 + $0x50] sm:$0xff] %v951_v55  ;;  %v468_v58 = vpop.f32.mrb[9].mxu0  ;;  %v1350_v3 = vpop.f32.mrb[8].mxu1  ;;  %v642_v4 = vmul.f32 %v951_v55, %v951_v55 }
 0x102   : > { %571 = vst [vmem:[%s1304_s18 + $0x40] sm:$0xff] %v468_v58  ;;  %v602_v59 = vadd.f32 %v601_v56, %v468_v58  ;;  %v640_v60 = vmul.f32 %v468_v58, %v468_v58  ;;  %v670_v61 = vadd.f32 %v669_v54, %v639_v53  ;;  %v952_v62 = vpop.f32.mrb[10].mxu0  ;;  %589 = vst [vmem:[%s1304_s18 + $0xd0] sm:$0xff] %v1350_v3  ;;  %v1354_v7 = vpop.f32.mrb[9].mxu1 }
 0x103   : > { %574 = vst [vmem:[%s1304_s18 + $0x58] sm:$0xff] %v952_v62  ;;  %v471_v63 = vpop.f32.mrb[11].mxu0  ;;  %587 = vst [vmem:[%s1304_s18 + $0xc0] sm:$0xff] %v1354_v7  ;;  %v1358_v8 = vpop.f32.mrb[10].mxu1  ;;  %v643_v9 = vmul.f32 %v952_v62, %v952_v62 }
 0x104   : > { %v671_v0 = vadd.f32 %v670_v61, %v640_v60  ;;  %572 = vst [vmem:[%s1304_s18 + $0x48] sm:$0xff] %v471_v63  ;;  %v603_v1 = vadd.f32 %v602_v59, %v471_v63  ;;  %v641_v2 = vmul.f32 %v471_v63, %v471_v63  ;;  %590 = vst [vmem:[%s1304_s18 + $0xd8] sm:$0xff] %v1358_v8  ;;  %v1362_v13 = vpop.f32.mrb[11].mxu1 }
 0x105   : > { %588 = vst [vmem:[%s1304_s18 + $0xc8] sm:$0xff] %v1362_v13 }
 0x106   : > { %v604_v5 = vadd.f32 %v951_v55, %v603_v1  ;;  %v672_v6 = vadd.f32 %v671_v0, %v641_v2 }
 0x108   : > { %v673_v10 = vadd.f32 %v672_v6, %v642_v4  ;;  %v955_v11 = vpop.f32.mrb[12].mxu0  ;;  %v605_v12 = vadd.f32 %v952_v62, %v604_v5 }
 0x109   : > { %577 = vst [vmem:[%s1304_s18 + $0x70] sm:$0xff] %v955_v11  ;;  %v484_v14 = vpop.f32.mrb[13].mxu0  ;;  %v1372_v23 = vpop.f32.mrb[12].mxu1  ;;  %v646_v24 = vmul.f32 %v955_v11, %v955_v11 }
 0x10a   : > { %575 = vst [vmem:[%s1304_s18 + $0x60] sm:$0xff] %v484_v14  ;;  %v606_v15 = vadd.f32 %v605_v12, %v484_v14  ;;  %v644_v16 = vmul.f32 %v484_v14, %v484_v14  ;;  %v674_v17 = vadd.f32 %v673_v10, %v643_v9  ;;  %v956_v18 = vpop.f32.mrb[14].mxu0  ;;  %593 = vst [vmem:[%s1304_s18 + $0xf0] sm:$0xff] %v1372_v23  ;;  %v1376_v28 = vpop.f32.mrb[13].mxu1 }
 0x10b   : > { %578 = vst [vmem:[%s1304_s18 + $0x78] sm:$0xff] %v956_v18  ;;  %v487_v19 = vpop.f32.mrb[15].mxu0  ;;  %591 = vst [vmem:[%s1304_s18 + $0xe0] sm:$0xff] %v1376_v28  ;;  %v1387_v29 = vpop.f32.mrb[14].mxu1  ;;  %v647_v30 = vmul.f32 %v956_v18, %v956_v18 }
 0x10c   : > { %v675_v20 = vadd.f32 %v674_v17, %v644_v16  ;;  %576 = vst [vmem:[%s1304_s18 + $0x68] sm:$0xff] %v487_v19  ;;  %v607_v21 = vadd.f32 %v606_v15, %v487_v19  ;;  %v645_v22 = vmul.f32 %v487_v19, %v487_v19  ;;  %594 = vst [vmem:[%s1304_s18 + $0xf8] sm:$0xff] %v1387_v29  ;;  %v1393_v36 = vpop.f32.mrb[15].mxu1 }
 0x10d   : > { %592 = vst [vmem:[%s1304_s18 + $0xe8] sm:$0xff] %v1393_v36 }
 0x10e   : > { %v608_v25 = vadd.f32 %v955_v11, %v607_v21  ;;  %v676_v26 = vadd.f32 %v675_v20, %v645_v22 }
 0x110   : > { %v677_v33 = vadd.f32 %v676_v26, %v646_v24  ;;  %v609_v34 = vadd.f32 %v956_v18, %v608_v25 }
 0x112   : > { %v610_v38 = vadd.f32 %v609_v34, %v1314_v31  ;;  %v678_v39 = vadd.f32 %v677_v33, %v647_v30 }
 0x113   : > { %1075 = shalt.err (!%p1072_p5)
}
 0x114   : > { %s1076_s6 = scalar_lea.hbm %s1381_s27, 4096  ;;  %s1080_s9 = scalar_lea.hbm %s1522_s2, 8192 }
 0x115   : > { %p1077_p6 = scmp.ne.s32.totalorder %s1381_s27, %s1076_s6  ;;  %p1081_p10 = scmp.lt.u32.totalorder %s1381_s27, %s1522_s2 }
 0x116   : > { %p1082_p11 = scmp.lt.u32.totalorder %s1080_s9, %s1076_s6  ;;  %p1084_p13 = scmp.lt.u32.totalorder %s1076_s6, %s1381_s27 }
 0x117   : > { %p1078_p7 = pnand %p1077_p6, %p1238_p4 }
 0x118   : > { %p1083_p12 = por %p1082_p11, %p1081_p10 }
 0x119   : > { %p1079_p9 = pneg %p1078_p7 }
 0x11a   : > { %p1085_p0 = por %p1084_p13, %p1083_p12 }
 0x11c   : > { %p1086_p1 = pnand %p1085_p0, %p1079_p9 }
 0x11e   : > { %1089 = shalt.err (!%p1086_p1)
}
 0x11f   : > { %s1175_s19 = smov 128   ;;  %s1176_s23 = smov 8   ;;  %v679_v31 = vadd.f32 %v678_v39, %v648_v35  ;;  %v611_v40 = vadd.f32 %v610_v38, %v1322_v37  ;;  %v649_v41 = vmul.f32 %v1322_v37, %v1322_v37  ;;  %v650_v42 = vmul.f32 %v1310_v27, %v1310_v27 }
 0x120   : > { %981 = dma.vmem_to_hbm [thread:$0]  (%p1238_p4), %s1383_s21, 4096, %s1381_s27, %s710_s28, %s1175_s19, %s1175_s19, %s1176_s23   ;;  %v651_v45 = vmul.f32 %v1318_v32, %v1318_v32  ;;  %v652_v49 = vmul.f32 %v1334_v51, %v1334_v51  ;;  %v653_v55 = vmul.f32 %v1342_v57, %v1342_v57  ;;  %v657_v0 = vmul.f32 %v1362_v13, %v1362_v13 }
 0x121   : > { %v612_v43 = vadd.f32 %v1310_v27, %v611_v40  ;;  %v680_v44 = vadd.f32 %v679_v31, %v649_v41  ;;  %v654_v27 = vmul.f32 %v1330_v47, %v1330_v47  ;;  %v660_v6 = vmul.f32 %v1376_v28, %v1376_v28  ;;  %s870_s21 = sshll.u32 %s1301_s10, 3  ;;  %s912_s26 = sshll.u32 %s1164_s15, 7 }
 0x122   : > { %v661_v12 = vmul.f32 %v1393_v36, %v1393_v36  ;;  %v701_v21 = vlaneseq  ;;  %s204_s27 = scalar_lea.vmem [#allocation4], %s870_s21  ;;  %s1472_s4 = scalar_lea.hbm %s1523_s3, %s912_s26 }
 0x123   : > { %v681_v46 = vadd.f32 %v680_v44, %v650_v42  ;;  %v613_v48 = vadd.f32 %v1318_v32, %v612_v43  ;;  %v655_v32 = vmul.f32 %v1338_v52, %v1338_v52  ;;  %s746_s28 = sshll.u32 %s204_s27, 4  ;;  %s715_s5 = scalar_lea.sflag [#allocation5], %s1301_s10  ;;  %s1474_s28 = int_to_ptr.vmem [resolvable:$true] %s746_s28 }
 0x124   : > { %s1090_s6 = scalar_lea.vmem %s1474_s28, 128  ;;  %s1177_s15 = smov [#allocation4]  }
 0x125   : > { %v614_v50 = vadd.f32 %v613_v48, %v1334_v51  ;;  %v682_v53 = vadd.f32 %v681_v46, %v651_v45  ;;  %v656_v51 = vmul.f32 %v1354_v7, %v1354_v7  ;;  %p1091_p2 = scmp.ne.s32.totalorder %s1474_s28, %s1090_s6  ;;  %s1094_s7 = sshll.u32 %s1177_s15, 4  ;;  %s1095_s7 = int_to_ptr.vmem [resolvable:$false] %s1094_s7 }
 0x126   : > { %s1096_s8 = scalar_lea.vmem %s1095_s7, 256  ;;  %p1097_p6 = scmp.lt.s32.totalorder %s1474_s28, %s1095_s7 }
 0x127   : > { %v683_v54 = vadd.f32 %v682_v53, %v652_v49  ;;  %v615_v37 = vadd.f32 %v614_v50, %v1342_v57  ;;  %p1092_p3 = pnand %p1091_p2, %p1238_p4  ;;  %p1098_p7 = scmp.lt.s32.totalorder %s1096_s8, %s1090_s6 }
 0x129   : > { %v616_v56 = vadd.f32 %v1330_v47, %v615_v37  ;;  %v684_v58 = vadd.f32 %v683_v54, %v653_v55  ;;  %v658_v47 = vmul.f32 %v1350_v3, %v1350_v3  ;;  %p1093_p5 = pneg %p1092_p3  ;;  %p1099_p9 = por %p1098_p7, %p1097_p6 }
 0x12b   : > { %v685_v59 = vadd.f32 %v684_v58, %v654_v27  ;;  %v617_v60 = vadd.f32 %v1338_v52, %v616_v56  ;;  %v659_v52 = vmul.f32 %v1358_v8, %v1358_v8  ;;  %p1100_p10 = pnand %p1099_p9, %p1093_p5 }
 0x12d   : > { %v618_v61 = vadd.f32 %v617_v60, %v1354_v7  ;;  %v686_v62 = vadd.f32 %v685_v59, %v655_v32 }
 0x12f   : > { %v687_v63 = vadd.f32 %v686_v62, %v656_v51  ;;  %v619_v57 = vadd.f32 %v618_v61, %v1362_v13 }
 0x131   : > { %v620_v1 = vadd.f32 %v1350_v3, %v619_v57  ;;  %v688_v2 = vadd.f32 %v687_v63, %v657_v0  ;;  %v662_v3 = vmul.f32 %v1372_v23, %v1372_v23 }
 0x133   : > { %v689_v4 = vadd.f32 %v688_v2, %v658_v47  ;;  %v621_v5 = vadd.f32 %v1358_v8, %v620_v1  ;;  %v663_v8 = vmul.f32 %v1387_v29, %v1387_v29 }
 0x135   : > { %v622_v7 = vadd.f32 %v621_v5, %v1376_v28  ;;  %v690_v9 = vadd.f32 %v689_v4, %v659_v52  ;;  %v702_v28 = vshrl.u32 %v701_v21, 7 }
 0x137   : > { %v691_v10 = vadd.f32 %v690_v9, %v660_v6  ;;  %v623_v11 = vadd.f32 %v622_v7, %v1393_v36  ;;  %vm703_vm2 = vcmp.eq.s32.totalorder %v702_v28, 0  ;;  %vm705_vm3 = vcmp.eq.s32.totalorder %v702_v28, 1 }
 0x139   : > { %v624_v13 = vadd.f32 %v1372_v23, %v623_v11  ;;  %v692_v14 = vadd.f32 %v691_v10, %v661_v12 }
 0x13b   : > { %v625_v15 = vadd.f32 %v1387_v29, %v624_v13  ;;  %v693_v16 = vadd.f32 %v692_v14, %v662_v3 }
 0x13d   : > { %v626_v17 = vrot.slane %v625_v15, 4  ;;  %v694_v18 = vadd.f32 %v693_v16, %v663_v8 }
 0x13f   : > { %v627_v19 = vadd.f32 %v626_v17, %v625_v15  ;;  %v695_v20 = vrot.slane %v694_v18, 4 }
 0x141   : > { %v628_v22 = vrot.slane %v627_v19, 2  ;;  %v696_v24 = vadd.f32 %v695_v20, %v694_v18 }
 0x143   : > { %v629_v25 = vadd.f32 %v628_v22, %v627_v19  ;;  %v697_v26 = vrot.slane %v696_v24, 2 }
 0x145   : > { %v630_v23 = vrot.slane %v629_v25, 1  ;;  %v698_v30 = vadd.f32 %v697_v26, %v696_v24 }
 0x147   : > { %v631_v33 = vadd.f32 %v630_v23, %v629_v25  ;;  %v699_v34 = vrot.slane %v698_v30, 1 }
 0x149   : > { %v700_v29 = vadd.f32 %v699_v34, %v698_v30  ;;  %v704_v35 = vsel %vm703_vm2, %v631_v33, 0.0 }
 0x14b   : > { %v706_v36 = vsel %vm705_vm3, %v700_v29, 0.0 }
 0x14c   : > { %v707_v38 = vadd.f32 %v706_v36, %v704_v35 }
 0x14e   : > { %708 = vst [vmem:[%s204_s27] sm:$0xff] %v707_v38 }
 0x14f   : > { %1103 = shalt.err (!%p1100_p10)
}
 0x150   : > { %s1104_s10 = scalar_lea.hbm %s1472_s4, 128  ;;  %s1108_s18 = scalar_lea.hbm %s1523_s3, 256 }
 0x151   : > { %p1105_p11 = scmp.ne.s32.totalorder %s1472_s4, %s1104_s10  ;;  %p1109_p0 = scmp.lt.u32.totalorder %s1472_s4, %s1523_s3 }
 0x152   : > { %p1110_p1 = scmp.lt.u32.totalorder %s1108_s18, %s1104_s10  ;;  %p1112_p3 = scmp.lt.u32.totalorder %s1104_s10, %s1472_s4 }
 0x153   : > { %p1106_p12 = pnand %p1105_p11, %p1238_p4 }
 0x154   : > { %p1111_p2 = por %p1110_p1, %p1109_p0 }
 0x155   : > { %p1107_p13 = pneg %p1106_p12 }
 0x156   : > { %p1113_p5 = por %p1112_p3, %p1111_p2 }
 0x158   : > { %p1114_p6 = pnand %p1113_p5, %p1107_p13 }
 0x15a   : > { %1117 = shalt.err (!%p1114_p6)
}
 0x15b   : > { %982 = dma.vmem_to_hbm [thread:$0]  (%p1238_p4), %s1474_s28, 128, %s1472_s4, %s715_s5  }
 0x15c PF: > { %p992_p7 = scmp.ge.s32.totalorder %s1172_s17, 2  ;;  %s758_s21 = sand.u32 1, %s1152_s12  }
 0x15d   : > { %s759_s26 = scalar_lea.sflag [#allocation3], %s758_s21 }
 0x15e   : > { %p986_p9 = pnand %p992_p7, %p1245_p8 }
 0x160   : > { %1143 = dma.done.wait (!%p986_p9), %s759_s26, 4096  }
 0x161   : > { %1145 = vsyncadd (!%p986_p9), %s759_s26, 4294963200  ;;  %s768_s27 = scalar_lea.sflag [#allocation5], %s758_s21 }
 0x162   : > { %1147 = dma.done.wait (!%p986_p9), %s768_s27, 128  }
 0x163   : > { %1149 = vsyncadd (!%p986_p9), %s768_s27, 4294967168  ;;  %s20_s17 = sadd.s32 1, %s1172_s17   ;;  %s1526_s12 = smov %s1156_s13 }
 0x164   : > { %p17_p10 = scmp.ge.s32.totalorder %s20_s17, 4   ;;  %s1527_s13 = smov %s1160_s14 }
 0x165   : > { %s1528_s14 = smov %s1251_s25  ;;  %s1529_s15 = smov %s1168_s16 }
 0x166   : > { %s1530_s16 = smov %s1532_s20  ;;  %19 = sbr.rel (!%p17_p10) target bundleno = 6 (0x6), region = 83 }
 0x16d   :  { %773 = vsyncpa [#allocation3], 1 }
 0x16e   :  { %775 = vsyncpa [#allocation3 + $0x1], 1 }
 0x16f   :  { %776 = vsyncpa [#allocation5], 1 }
 0x170   :  { %778 = vsyncpa [#allocation5 + $0x1], 1 }

</bundles_post_ra>
